<compile_context>
chip_gen: v7x
topology: tpu7x:2x2x1
jax: 0.10.0
libtpu: 0.0.40
codegen_flags: <defaults>
</compile_context>

<pallas_src>
import math
import functools

import jax
import jax.numpy as jnp
from jax import lax
from jax.experimental import pallas as pl
from jax.experimental.pallas import tpu as pltpu


def _round_up(a, m):
    return ((a + m - 1) // m) * m


def _gelu_tanh(x):
    # tanh approximation (transcendental -> EUP slot). Close to nn.GELU's exact
    # erf form (~1e-3 max abs err); keeps the VALU slot free for the CIF min/max.
    c = 0.7978845608028654  # sqrt(2/pi)
    return 0.5 * x * (1.0 + jnp.tanh(c * (x + 0.044715 * x * x * x)))


def _cif_layer_kernel(x_ref, mask_ref, wconv_ref, par_ref,
                      out_ref, alpha_ref, asum_ref,
                      csum_s, left_s,
                      *, T, C, C_pad, K, TILE_NT, beta, tail_thres,
                      mxu_dtype, recompute_alpha):
    f32 = jnp.float32
    j = pl.program_id(1)        # output-bin chunk index (row tiling of CIF block)

    # ---------- alpha projection + prefix sum ----------
    # Runs once per batch element (chunk 0) in the default mode; recomputed per
    # chunk when B==1 so the chunk axis can be "parallel" (v7x megacore).
    def _alpha_pass():
        x = x_ref[0]                                    # (T, C_pad) mxu_dtype
        keep = 1.0 - mask_ref[0]                        # (1, T); 1.0 = valid frame
        par = par_ref[...]                              # (8, H) packed small params

        # CausalConvTBC as one im2col matmul: out[t] = sum_k x[t-(K-1-k)] @ W[k].
        # Padded feature columns (incl. the delay src column) have zero weights,
        # so the full C_pad width can be fed directly (keeps lanes aligned).
        cols = []
        for k in range(K):
            s = K - 1 - k
            if s == 0:
                cols.append(x)
            else:
                pad = jnp.zeros((s, C_pad), x.dtype)
                cols.append(jnp.concatenate([pad, x[:T - s, :]], axis=0))
        im2col = jnp.concatenate(cols, axis=1)          # (T, K*C_pad)
        acc = jnp.dot(im2col, wconv_ref[...], preferred_element_type=f32)
        acc = acc + par[0:1, :]                         # conv bias, (T, H) f32

        # LayerNorm (eps=1e-5) -> GELU. nn.Dropout is identity at inference.
        mu = jnp.mean(acc, axis=-1, keepdims=True)
        var = jnp.mean((acc - mu) ** 2, axis=-1, keepdims=True)
        h = (acc - mu) * lax.rsqrt(var + 1e-5) * par[1:2, :] + par[2:3, :]
        h = _gelu_tanh(h)

        # Linear(H, 1) + sigmoid via VPU multiply + lane reduce (no N=1 matmul).
        logit = jnp.sum(h * par[3:4, :], axis=-1, keepdims=True) + par[4:5, 0:1]
        alpha_col = 1.0 / (1.0 + jnp.exp(-logit))       # (T, 1)
        alpha_row = jnp.transpose(alpha_col) * keep     # (1, T), padded frames -> 0
        alpha_ref[0] = alpha_row

        # Inclusive prefix sum along T: log2(T) shift+add steps (no (T,T) matmul).
        csum = alpha_row
        d = 1
        while d < T:
            shifted = jnp.concatenate(
                [jnp.zeros((1, d), f32), csum[:, :T - d]], axis=1)
            csum = csum + shifted
            d *= 2
        csum_s[...] = csum
        left_s[...] = csum - alpha_row
        asum_ref[0] = csum[:, T - 1:T]                  # alpha.sum(1)

    if recompute_alpha:
        _alpha_pass()
    else:
        pl.when(j == 0)(_alpha_pass)

    # ---------- CIF: rows [j*TILE_NT, (j+1)*TILE_NT) of the bin-overlap weights
    csum = csum_s[...]                                  # (1, T)
    left = left_s[...]                                  # (1, T)
    asum = csum[:, T - 1:T]                             # (1, 1)

    feat_len = jnp.floor(asum * (1.0 / beta))           # number of full fires
    feat_len_i = feat_len.astype(jnp.int32)
    tail_w = asum - feat_len * beta                     # leftover (tail) mass
    extend = tail_w >= tail_thres                       # extend one fire?

    nt0 = j * TILE_NT
    nt_col_i = nt0 + lax.broadcasted_iota(jnp.int32, (TILE_NT, 1), 0)   # (TILE_NT,1)
    is_tail = jnp.logical_and(nt_col_i == feat_len_i, extend)           # int compare
    scale = jnp.where(is_tail, beta / jnp.maximum(tail_w, 1e-8), 1.0)
    feat_fin_i = feat_len_i + extend.astype(jnp.int32)
    keep_t = (nt_col_i < feat_fin_i).astype(f32)
    factor = scale * keep_t                                             # (TILE_NT,1)

    # Bin edges as a per-row column broadcast against the (1,T) csum/left rows:
    # no (TILE_NT,T) iota and no (TILE_NT,T) multiplies.
    edge = nt_col_i.astype(f32) * beta                                  # (TILE_NT,1)
    r_edge = jnp.minimum(csum, edge + beta)                             # (TILE_NT,T)
    l_edge = jnp.maximum(left, edge)
    w = jnp.maximum(r_edge - l_edge, 0.0)               # overlap weights per bin

    # Padded frames have alpha == 0 exactly -> their w column is exactly 0, so the
    # reference's x.masked_fill(pad, 0) is redundant here.  Column C of x carries
    # src = (t+1)/beta, so this single MXU matmul also produces the delays.
    out = jnp.dot(w.astype(mxu_dtype), x_ref[0].astype(mxu_dtype),
                  preferred_element_type=f32)                           # (TILE_NT,C_pad)

    # Tail rescale / bin masking applies to the features only; the delay column
    # (lane C) stays unscaled, matching the reference cif_function (which never
    # multiplies `delay` by the upscale factor).
    lane = lax.broadcasted_iota(jnp.int32, (1, C_pad), 1)
    col_scale = jnp.where(lane == C, 1.0, factor)                       # (TILE_NT,C_pad)
    out_ref[0] = (out * col_scale).astype(out_ref.dtype)


def cif_layer_forward(x_tbc, encoder_padding_mask, params, *, beta=1.0,
                      tail_thres=None, tile_nt=None, use_bf16_mxu=True):
    """x_tbc: (T, B, C) like the PyTorch module; mask: (B, T) with 1/True = pad.

    Note: with use_bf16_mxu=True both matmuls run in bf16 with f32 accumulation
    (~1e-2 tolerance); set it False for strict-f32 parity (e.g. very long T).
    """
    T, B, C = x_tbc.shape
    K, Cw, H = params["conv_w"].shape
    assert Cw == C
    if tail_thres is None:
        tail_thres = beta / 2.0
    NT = int(math.floor(T / beta)) + 1                  # static bound on output length

    # ----- generation-aware VMEM budget / tile selection -----
    try:
        vmem_cap = int(getattr(pltpu.get_tpu_info(), "vmem_capacity_bytes",
                               64 * 2 ** 20))
    except Exception:
        vmem_cap = 64 * 2 ** 20
    big_vmem = vmem_cap >= 100 * 2 ** 20                # v5e / v6e (128 MiB) vs v7x (64)
    if tile_nt is None:
        tile_nt = 1024 if big_vmem else 256
    budget = (96 if big_vmem else 44) * 2 ** 20

    C_pad = _round_up(C + 1, 128)                       # +1 lane: fused delay src column
    in_b = 2 if use_bf16_mxu else 4

    def _vmem_est(tnt):
        return (2 * T * C_pad * in_b                    # x block (double-buffered)
                + 2 * T * 4                             # padding mask
                + 2 * K * C_pad * H * in_b              # conv weight (im2col layout)
                + 2 * 8 * H * 4                         # packed small params
                + 2 * tnt * C_pad * 4                   # out block
                + 2 * T * 4 + 64                        # alpha / alpha_sum blocks
                + 2 * T * 4                             # csum / left scratch
                + T * K * C_pad * in_b + 4 * T * H * 4  # alpha-pass temps
                + 3 * tnt * T * 4 + tnt * T * in_b      # r/l edges, w (+ bf16 cast)
                + 2 * tnt * C_pad * 4)                  # matmul result + scaled copy

    TILE_NT = _round_up(min(NT, tile_nt), 8)            # single chunk if it fits
    if TILE_NT < NT:
        TILE_NT = _round_up(TILE_NT, 128)               # lane-aligned chunks
    while TILE_NT > 128 and _vmem_est(TILE_NT) > budget:
        TILE_NT = _round_up(max(128, TILE_NT // 2), 128)
    NT_pad = _round_up(NT, TILE_NT)
    nchunks = NT_pad // TILE_NT
    vmem_limit = int(min(budget, max(16 * 2 ** 20, 2 * _vmem_est(TILE_NT))))

    mxu_dtype = jnp.bfloat16 if use_bf16_mxu else jnp.float32

    # ----- input prep: lane-padded x with the delay source in column C -----
    x_btc = jnp.transpose(x_tbc, (1, 0, 2)).astype(jnp.float32)
    src = jnp.arange(1, T + 1, dtype=jnp.float32) / float(beta)
    x_aug = jnp.zeros((B, T, C_pad), jnp.float32)
    x_aug = x_aug.at[:, :, :C].set(x_btc)
    x_aug = x_aug.at[:, :, C].set(src[None, :])
    x_aug = x_aug.astype(mxu_dtype)

    mask_f = encoder_padding_mask.astype(jnp.float32).reshape(B, 1, T)

    conv_w = jnp.zeros((K, C_pad, H), jnp.float32)
    conv_w = conv_w.at[:, :C, :].set(params["conv_w"].astype(jnp.float32))
    conv_w = conv_w.reshape(K * C_pad, H).astype(mxu_dtype)

    par8 = jnp.zeros((8, H), jnp.float32)               # packed small parameters
    par8 = par8.at[0].set(params["conv_b"].astype(jnp.float32))
    par8 = par8.at[1].set(params["ln_g"].astype(jnp.float32))
    par8 = par8.at[2].set(params["ln_b"].astype(jnp.float32))
    par8 = par8.at[3].set(params["lin_w"].reshape(H).astype(jnp.float32))
    par8 = par8.at[4, 0].set(params["lin_b"].reshape(()).astype(jnp.float32))

    # B==1 streaming: recompute the cheap alpha pass per chunk so the chunk axis
    # is independent ("parallel") -> both v7x TensorCores stay busy.
    recompute_alpha = (B == 1 and nchunks > 1)
    dim_sem = ("parallel", "parallel") if recompute_alpha else ("parallel", "arbitrary")

    kernel = functools.partial(
        _cif_layer_kernel, T=T, C=C, C_pad=C_pad, K=K, TILE_NT=TILE_NT,
        beta=float(beta), tail_thres=float(tail_thres), mxu_dtype=mxu_dtype,
        recompute_alpha=recompute_alpha)

    out_shapes = (
        jax.ShapeDtypeStruct((B, NT_pad, C_pad), jnp.float32),  # features | delays
        jax.ShapeDtypeStruct((B, 1, T), jnp.float32),           # alpha
        jax.ShapeDtypeStruct((B, 1, 1), jnp.float32),           # alpha_sum
    )
    in_specs = [
        pl.BlockSpec((1, T, C_pad), lambda b, j: (b, 0, 0)),    # x (+ delay src col)
        pl.BlockSpec((1, 1, T), lambda b, j: (b, 0, 0)),        # padding mask
        pl.BlockSpec((K * C_pad, H), lambda b, j: (0, 0)),      # conv weight (im2col)
        pl.BlockSpec((8, H), lambda b, j: (0, 0)),              # packed small params
    ]
    out_specs = (
        pl.BlockSpec((1, TILE_NT, C_pad), lambda b, j: (b, j, 0)),
        pl.BlockSpec((1, 1, T), lambda b, j: (b, 0, 0)),
        pl.BlockSpec((1, 1, 1), lambda b, j: (b, 0, 0)),
    )
    scratch_shapes = [pltpu.VMEM((1, T), jnp.float32),          # csum
                      pltpu.VMEM((1, T), jnp.float32)]          # left integration edge

    outs = pl.pallas_call(
        kernel,
        out_shape=out_shapes,
        grid=(B, nchunks),
        in_specs=in_specs,
        out_specs=out_specs,
        scratch_shapes=scratch_shapes,
        compiler_params=pltpu.CompilerParams(
            dimension_semantics=dim_sem,
            vmem_limit_bytes=vmem_limit),
    )(x_aug, mask_f, conv_w, par8)

    out_full, alpha3, asum3 = outs
    alpha = alpha3[:, 0, :]                              # (B, T)
    alpha_sum = asum3[:, 0, 0]                           # (B,)
    delays = out_full[:, :NT, C]                         # (B, NT) from the fused column
    cif_feats = jnp.transpose(out_full[:, :NT, :C], (1, 0, 2))   # (T_out(pad), B, C)

    feat_len = jnp.floor(alpha_sum / beta)
    tail_w = alpha_sum - feat_len * beta
    cif_lengths = (feat_len
                   + (tail_w >= tail_thres).astype(jnp.float32)).astype(jnp.int32)

    return {
        "cif_out": [cif_feats],
        "cif_lengths": [cif_lengths],
        "alpha": [alpha],
        "alpha_sum": [alpha_sum],
        "delays": [delays],
        "tail_weights": [tail_w],
    }


def init_params(key, in_features, hidden_dim, kernel_size):
    k0, k1, k2 = jax.random.split(key, 3)
    return {
        "conv_w": 0.1 * jax.random.normal(k0, (kernel_size, in_features, hidden_dim), jnp.float32),
        "conv_b": 0.1 * jax.random.normal(k1, (hidden_dim,), jnp.float32),
        "ln_g": jnp.ones((hidden_dim,), jnp.float32),
        "ln_b": jnp.zeros((hidden_dim,), jnp.float32),
        "lin_w": 0.1 * jax.random.normal(k2, (hidden_dim, 1), jnp.float32),
        "lin_b": jnp.zeros((1,), jnp.float32),
    }


if __name__ == "__main__":
    key = jax.random.PRNGKey(0)
    kx, kp = jax.random.split(key)

    # Config 1: small single-chunk case (matches the module's expected shapes).
    T, B, C, H, K = 16, 2, 32, 32, 3
    x = jax.random.normal(kx, (T, B, C), jnp.float32)            # (seq_len, batch, embed)
    lengths = jnp.array([T, T - 4], dtype=jnp.int32)
    padding_mask = jnp.arange(T)[None, :] >= lengths[:, None]    # (B, T), True = pad
    params = init_params(kp, C, H, K)
    out1 = cif_layer_forward(x, padding_mask, params, beta=1.0)
    jax.block_until_ready(jax.tree_util.tree_leaves(out1))

    # Config 2: longer sequence forcing the chunked (multi NT-tile) CIF path.
    T2 = 320
    kx2, kp2 = jax.random.split(kp)
    x2 = jax.random.normal(kx2, (T2, B, C), jnp.float32)
    lengths2 = jnp.array([T2, T2 - 37], dtype=jnp.int32)
    padding_mask2 = jnp.arange(T2)[None, :] >= lengths2[:, None]
    params2 = init_params(kp2, C, H, K)
    out2 = cif_layer_forward(x2, padding_mask2, params2, beta=1.0, tile_nt=128)
    jax.block_until_ready(jax.tree_util.tree_leaves(out2))

    print("KERNEL_OK")
</pallas_src>

<mosaic_0001>
module attributes {stable_mosaic.version = 11 : i64} {
  func.func @_cif_layer_kernel(%arg0: i32, %arg1: i32, %arg2: memref<1x16x128xbf16, #tpu.memory_space<vmem>>, %arg3: memref<1x1x16xf32, #tpu.memory_space<vmem>>, %arg4: memref<384x32xbf16, #tpu.memory_space<vmem>>, %arg5: memref<8x32xf32, #tpu.memory_space<vmem>>, %arg6: memref<1x24x128xf32, #tpu.memory_space<vmem>>, %arg7: memref<1x1x16xf32, #tpu.memory_space<vmem>>, %arg8: memref<1x1x1xf32, #tpu.memory_space<vmem>>, %arg9: memref<1x16xf32, #tpu.memory_space<vmem>>, %arg10: memref<1x16xf32, #tpu.memory_space<vmem>>) attributes {dimension_semantics = [#tpu.dimension_semantics<parallel>, #tpu.dimension_semantics<arbitrary>], iteration_bounds = array<i64: 2, 1>, scalar_prefetch = 0 : i64, scratch_operands = 2 : i64, tpu.core_type = #tpu.core_type<tc>, window_params = [{transform_indices = @transform_0, window_bounds = array<i64: 1, 16, 128>}, {transform_indices = @transform_1, window_bounds = array<i64: 1, 1, 16>}, {pipeline_mode = #tpu.pipeline_mode<synchronous>, transform_indices = @transform_2, window_bounds = array<i64: 384, 32>}, {pipeline_mode = #tpu.pipeline_mode<synchronous>, transform_indices = @transform_3, window_bounds = array<i64: 8, 32>}, {transform_indices = @transform_4, window_bounds = array<i64: 1, 24, 128>}, {transform_indices = @transform_5, window_bounds = array<i64: 1, 1, 16>}, {transform_indices = @transform_6, window_bounds = array<i64: 1, 1, 1>}]} {
    %c0_i32 = arith.constant 0 : i32
    %0 = arith.cmpi eq, %arg1, %c0_i32 : i32
    %1 = arith.extui %0 : i1 to i32
    %c0_i32_0 = arith.constant 0 : i32
    %2 = arith.cmpi ne, %1, %c0_i32_0 : i32
    scf.if %2 {
      %c0_20 = arith.constant 0 : index
      %c0_21 = arith.constant 0 : index
      %c0_22 = arith.constant 0 : index
      %69 = vector.load %arg2[%c0_20, %c0_21, %c0_22] : memref<1x16x128xbf16, #tpu.memory_space<vmem>>, vector<1x16x128xbf16>
      %70 = vector.shape_cast %69 : vector<1x16x128xbf16> to vector<16x128xbf16>
      %c0_23 = arith.constant 0 : index
      %c0_24 = arith.constant 0 : index
      %c0_25 = arith.constant 0 : index
      %71 = vector.load %arg3[%c0_23, %c0_24, %c0_25] : memref<1x1x16xf32, #tpu.memory_space<vmem>>, vector<1x1x16xf32>
      %72 = vector.shape_cast %71 : vector<1x1x16xf32> to vector<1x16xf32>
      %cst_26 = arith.constant 1.000000e+00 : f32
      %73 = vector.broadcast %cst_26 : f32 to vector<1x16xf32>
      %74 = arith.subf %73, %72 : vector<1x16xf32>
      %c0_27 = arith.constant 0 : index
      %c0_28 = arith.constant 0 : index
      %75 = vector.load %arg5[%c0_27, %c0_28] : memref<8x32xf32, #tpu.memory_space<vmem>>, vector<8x32xf32>
      %cst_29 = arith.constant 0.000000e+00 : bf16
      %76 = vector.broadcast %cst_29 : bf16 to vector<2x128xbf16>
      %77 = vector.extract_strided_slice %70 {offsets = [0, 0], sizes = [14, 128], strides = [1, 1]} : vector<16x128xbf16> to vector<14x128xbf16>
      %78 = tpu.concatenate %76, %77 in 0 : vector<2x128xbf16>, vector<14x128xbf16> -> vector<16x128xbf16>
      %cst_30 = arith.constant 0.000000e+00 : bf16
      %79 = vector.broadcast %cst_30 : bf16 to vector<1x128xbf16>
      %80 = vector.extract_strided_slice %70 {offsets = [0, 0], sizes = [15, 128], strides = [1, 1]} : vector<16x128xbf16> to vector<15x128xbf16>
      %81 = tpu.concatenate %79, %80 in 0 : vector<1x128xbf16>, vector<15x128xbf16> -> vector<16x128xbf16>
      %82 = tpu.concatenate %78, %81, %70 in 1 : vector<16x128xbf16>, vector<16x128xbf16>, vector<16x128xbf16> -> vector<16x384xbf16>
      %c0_31 = arith.constant 0 : index
      %c0_32 = arith.constant 0 : index
      %83 = vector.load %arg4[%c0_31, %c0_32] : memref<384x32xbf16, #tpu.memory_space<vmem>>, vector<384x32xbf16>
      %cst_33 = arith.constant dense<0.000000e+00> : vector<16x32xf32>
      %84 = tpu.matmul %82, %83, %cst_33 {dimension_numbers = #tpu.dot_dimension_numbers<[1], [0], [0], [1], [0, 0, 1, 1], [], []>} : vector<16x384xbf16>, vector<384x32xbf16>, vector<16x32xf32> -> vector<16x32xf32>
      %85 = vector.extract_strided_slice %75 {offsets = [0, 0], sizes = [1, 32], strides = [1, 1]} : vector<8x32xf32> to vector<1x32xf32>
      %86 = vector.broadcast %85 : vector<1x32xf32> to vector<16x32xf32>
      %87 = arith.addf %84, %86 : vector<16x32xf32>
      %cst_34 = arith.constant dense<0.000000e+00> : vector<16xf32>
      %88 = vector.multi_reduction <add>, %87, %cst_34 [1] : vector<16x32xf32> to vector<16xf32>
      %89 = vector.shape_cast %88 : vector<16xf32> to vector<16x1xf32>
      %cst_35 = arith.constant 3.200000e+01 : f32
      %90 = vector.broadcast %cst_35 : f32 to vector<16x1xf32>
      %91 = arith.divf %89, %90 : vector<16x1xf32>
      %92 = vector.broadcast %91 : vector<16x1xf32> to vector<16x32xf32>
      %93 = arith.subf %87, %92 : vector<16x32xf32>
      %94 = arith.mulf %93, %93 : vector<16x32xf32>
      %cst_36 = arith.constant dense<0.000000e+00> : vector<16xf32>
      %95 = vector.multi_reduction <add>, %94, %cst_36 [1] : vector<16x32xf32> to vector<16xf32>
      %96 = vector.shape_cast %95 : vector<16xf32> to vector<16x1xf32>
      %cst_37 = arith.constant 3.200000e+01 : f32
      %97 = vector.broadcast %cst_37 : f32 to vector<16x1xf32>
      %98 = arith.divf %96, %97 : vector<16x1xf32>
      %99 = vector.broadcast %91 : vector<16x1xf32> to vector<16x32xf32>
      %100 = arith.subf %87, %99 : vector<16x32xf32>
      %cst_38 = arith.constant 9.99999974E-6 : f32
      %101 = vector.broadcast %cst_38 : f32 to vector<16x1xf32>
      %102 = arith.addf %98, %101 : vector<16x1xf32>
      %103 = math.rsqrt %102 : vector<16x1xf32>
      %104 = vector.broadcast %103 : vector<16x1xf32> to vector<16x32xf32>
      %105 = arith.mulf %100, %104 : vector<16x32xf32>
      %106 = vector.extract_strided_slice %75 {offsets = [1, 0], sizes = [1, 32], strides = [1, 1]} : vector<8x32xf32> to vector<1x32xf32>
      %107 = vector.broadcast %106 : vector<1x32xf32> to vector<16x32xf32>
      %108 = arith.mulf %105, %107 : vector<16x32xf32>
      %109 = vector.extract_strided_slice %75 {offsets = [2, 0], sizes = [1, 32], strides = [1, 1]} : vector<8x32xf32> to vector<1x32xf32>
      %110 = vector.broadcast %109 : vector<1x32xf32> to vector<16x32xf32>
      %111 = arith.addf %108, %110 : vector<16x32xf32>
      %cst_39 = arith.constant 5.000000e-01 : f32
      %112 = vector.broadcast %cst_39 : f32 to vector<16x32xf32>
      %113 = arith.mulf %112, %111 : vector<16x32xf32>
      %cst_40 = arith.constant 4.471500e-02 : f32
      %114 = vector.broadcast %cst_40 : f32 to vector<16x32xf32>
      %115 = arith.mulf %114, %111 : vector<16x32xf32>
      %116 = arith.mulf %115, %111 : vector<16x32xf32>
      %117 = arith.mulf %116, %111 : vector<16x32xf32>
      %118 = arith.addf %111, %117 : vector<16x32xf32>
      %cst_41 = arith.constant 0.797884583 : f32
      %119 = vector.broadcast %cst_41 : f32 to vector<16x32xf32>
      %120 = arith.mulf %119, %118 : vector<16x32xf32>
      %121 = math.tanh %120 : vector<16x32xf32>
      %cst_42 = arith.constant 1.000000e+00 : f32
      %122 = vector.broadcast %cst_42 : f32 to vector<16x32xf32>
      %123 = arith.addf %122, %121 : vector<16x32xf32>
      %124 = arith.mulf %113, %123 : vector<16x32xf32>
      %125 = vector.extract_strided_slice %75 {offsets = [3, 0], sizes = [1, 32], strides = [1, 1]} : vector<8x32xf32> to vector<1x32xf32>
      %126 = vector.broadcast %125 : vector<1x32xf32> to vector<16x32xf32>
      %127 = arith.mulf %124, %126 : vector<16x32xf32>
      %cst_43 = arith.constant dense<0.000000e+00> : vector<16xf32>
      %128 = vector.multi_reduction <add>, %127, %cst_43 [1] : vector<16x32xf32> to vector<16xf32>
      %129 = vector.shape_cast %128 : vector<16xf32> to vector<16x1xf32>
      %130 = vector.extract_strided_slice %75 {offsets = [4, 0], sizes = [1, 1], strides = [1, 1]} : vector<8x32xf32> to vector<1x1xf32>
      %131 = vector.broadcast %130 : vector<1x1xf32> to vector<16x1xf32>
      %132 = arith.addf %129, %131 : vector<16x1xf32>
      %cst_44 = arith.constant 0.000000e+00 : f32
      %133 = vector.broadcast %cst_44 : f32 to vector<16x1xf32>
      %134 = arith.subf %133, %132 : vector<16x1xf32>
      %135 = math.exp %134 : vector<16x1xf32>
      %cst_45 = arith.constant 1.000000e+00 : f32
      %136 = vector.broadcast %cst_45 : f32 to vector<16x1xf32>
      %137 = arith.addf %136, %135 : vector<16x1xf32>
      %cst_46 = arith.constant 1.000000e+00 : f32
      %138 = vector.broadcast %cst_46 : f32 to vector<16x1xf32>
      %139 = arith.divf %138, %137 : vector<16x1xf32>
      %140 = tpu.transpose %139, [1, 0] : vector<16x1xf32> -> vector<1x16xf32>
      %141 = arith.mulf %140, %74 : vector<1x16xf32>
      %c0_47 = arith.constant 0 : index
      %c0_48 = arith.constant 0 : index
      %c0_49 = arith.constant 0 : index
      %142 = vector.load %arg7[%c0_47, %c0_48, %c0_49] : memref<1x1x16xf32, #tpu.memory_space<vmem>>, vector<1x1x16xf32>
      %143 = vector.shape_cast %142 : vector<1x1x16xf32> to vector<1x16xf32>
      %144 = vector.shape_cast %141 : vector<1x16xf32> to vector<1x1x16xf32>
      tpu.vector_store %arg7[%c0_47, %c0_48, %c0_49], %144 {strides = array<i32>} : memref<1x1x16xf32, #tpu.memory_space<vmem>>, vector<1x1x16xf32>,
      %cst_50 = arith.constant 0.000000e+00 : f32
      %145 = vector.broadcast %cst_50 : f32 to vector<1x1xf32>
      %146 = vector.extract_strided_slice %141 {offsets = [0, 0], sizes = [1, 15], strides = [1, 1]} : vector<1x16xf32> to vector<1x15xf32>
      %147 = tpu.concatenate %145, %146 in 1 : vector<1x1xf32>, vector<1x15xf32> -> vector<1x16xf32>
      %148 = arith.addf %141, %147 : vector<1x16xf32>
      %cst_51 = arith.constant 0.000000e+00 : f32
      %149 = vector.broadcast %cst_51 : f32 to vector<1x2xf32>
      %150 = vector.extract_strided_slice %148 {offsets = [0, 0], sizes = [1, 14], strides = [1, 1]} : vector<1x16xf32> to vector<1x14xf32>
      %151 = tpu.concatenate %149, %150 in 1 : vector<1x2xf32>, vector<1x14xf32> -> vector<1x16xf32>
      %152 = arith.addf %148, %151 : vector<1x16xf32>
      %cst_52 = arith.constant 0.000000e+00 : f32
      %153 = vector.broadcast %cst_52 : f32 to vector<1x4xf32>
      %154 = vector.extract_strided_slice %152 {offsets = [0, 0], sizes = [1, 12], strides = [1, 1]} : vector<1x16xf32> to vector<1x12xf32>
      %155 = tpu.concatenate %153, %154 in 1 : vector<1x4xf32>, vector<1x12xf32> -> vector<1x16xf32>
      %156 = arith.addf %152, %155 : vector<1x16xf32>
      %cst_53 = arith.constant 0.000000e+00 : f32
      %157 = vector.broadcast %cst_53 : f32 to vector<1x8xf32>
      %158 = vector.extract_strided_slice %156 {offsets = [0, 0], sizes = [1, 8], strides = [1, 1]} : vector<1x16xf32> to vector<1x8xf32>
      %159 = tpu.concatenate %157, %158 in 1 : vector<1x8xf32>, vector<1x8xf32> -> vector<1x16xf32>
      %160 = arith.addf %156, %159 : vector<1x16xf32>
      %c0_54 = arith.constant 0 : index
      %c0_55 = arith.constant 0 : index
      %161 = vector.load %arg9[%c0_54, %c0_55] : memref<1x16xf32, #tpu.memory_space<vmem>>, vector<1x16xf32>
      tpu.vector_store %arg9[%c0_54, %c0_55], %160 {strides = array<i32>} : memref<1x16xf32, #tpu.memory_space<vmem>>, vector<1x16xf32>,
      %162 = arith.subf %160, %141 : vector<1x16xf32>
      %c0_56 = arith.constant 0 : index
      %c0_57 = arith.constant 0 : index
      %163 = vector.load %arg10[%c0_56, %c0_57] : memref<1x16xf32, #tpu.memory_space<vmem>>, vector<1x16xf32>
      tpu.vector_store %arg10[%c0_56, %c0_57], %162 {strides = array<i32>} : memref<1x16xf32, #tpu.memory_space<vmem>>, vector<1x16xf32>,
      %164 = vector.extract_strided_slice %160 {offsets = [0, 15], sizes = [1, 1], strides = [1, 1]} : vector<1x16xf32> to vector<1x1xf32>
      %c0_58 = arith.constant 0 : index
      %c0_59 = arith.constant 0 : index
      %c0_60 = arith.constant 0 : index
      %165 = vector.load %arg8[%c0_58, %c0_59, %c0_60] : memref<1x1x1xf32, #tpu.memory_space<vmem>>, vector<1x1x1xf32>
      %166 = vector.shape_cast %165 : vector<1x1x1xf32> to vector<1x1xf32>
      %167 = vector.shape_cast %164 : vector<1x1xf32> to vector<1x1x1xf32>
      tpu.vector_store %arg8[%c0_58, %c0_59, %c0_60], %167 {strides = array<i32>} : memref<1x1x1xf32, #tpu.memory_space<vmem>>, vector<1x1x1xf32>,
    } else {
    }
    %c0 = arith.constant 0 : index
    %c0_1 = arith.constant 0 : index
    %3 = vector.load %arg9[%c0, %c0_1] : memref<1x16xf32, #tpu.memory_space<vmem>>, vector<1x16xf32>
    %c0_2 = arith.constant 0 : index
    %c0_3 = arith.constant 0 : index
    %4 = vector.load %arg10[%c0_2, %c0_3] : memref<1x16xf32, #tpu.memory_space<vmem>>, vector<1x16xf32>
    %5 = vector.extract_strided_slice %3 {offsets = [0, 15], sizes = [1, 1], strides = [1, 1]} : vector<1x16xf32> to vector<1x1xf32>
    %cst = arith.constant 1.000000e+00 : f32
    %6 = vector.broadcast %cst : f32 to vector<1x1xf32>
    %7 = arith.mulf %5, %6 : vector<1x1xf32>
    %8 = math.floor %7 : vector<1x1xf32>
    %9 = arith.fptosi %8 : vector<1x1xf32> to vector<1x1xi32>
    %cst_4 = arith.constant 1.000000e+00 : f32
    %10 = vector.broadcast %cst_4 : f32 to vector<1x1xf32>
    %11 = arith.mulf %8, %10 : vector<1x1xf32>
    %12 = arith.subf %5, %11 : vector<1x1xf32>
    %cst_5 = arith.constant 5.000000e-01 : f32
    %13 = vector.broadcast %cst_5 : f32 to vector<1x1xf32>
    %14 = arith.cmpf oge, %12, %13 : vector<1x1xf32>
    %c24_i32 = arith.constant 24 : i32
    %15 = arith.muli %arg1, %c24_i32 : i32
    %16 = tpu.iota {dimensions = array<i32: 0>} : vector<24x1xi32>
    %17 = vector.broadcast %15 : i32 to vector<24x1xi32>
    %18 = arith.addi %17, %16 : vector<24x1xi32>
    %19 = vector.broadcast %9 : vector<1x1xi32> to vector<24x1xi32>
    %20 = arith.cmpi eq, %18, %19 : vector<24x1xi32>
    %21 = vector.broadcast %14 : vector<1x1xi1> to vector<24x1xi1>
    %22 = arith.andi %20, %21 : vector<24x1xi1>
    %cst_6 = arith.constant 9.99999993E-9 : f32
    %23 = vector.broadcast %cst_6 : f32 to vector<1x1xf32>
    %24 = arith.maximumf %12, %23 : vector<1x1xf32>
    %cst_7 = arith.constant 1.000000e+00 : f32
    %25 = vector.broadcast %cst_7 : f32 to vector<1x1xf32>
    %26 = arith.divf %25, %24 : vector<1x1xf32>
    %cst_8 = arith.constant 1.000000e+00 : f32
    %27 = vector.shape_cast %26 : vector<1x1xf32> to vector<1x1xf32>
    %28 = vector.broadcast %27 : vector<1x1xf32> to vector<24x1xf32>
    %29 = vector.broadcast %cst_8 : f32 to vector<24x1xf32>
    %30 = arith.select %22, %28, %29 : vector<24x1xi1>, vector<24x1xf32>
    %31 = arith.extui %14 : vector<1x1xi1> to vector<1x1xi32>
    %32 = arith.addi %9, %31 : vector<1x1xi32>
    %33 = vector.broadcast %32 : vector<1x1xi32> to vector<24x1xi32>
    %34 = arith.cmpi slt, %18, %33 : vector<24x1xi32>
    %35 = arith.extui %34 : vector<24x1xi1> to vector<24x1xi32>
    %36 = arith.sitofp %35 : vector<24x1xi32> to vector<24x1xf32>
    %37 = arith.mulf %30, %36 : vector<24x1xf32>
    %38 = arith.sitofp %18 : vector<24x1xi32> to vector<24x1xf32>
    %cst_9 = arith.constant 1.000000e+00 : f32
    %39 = vector.broadcast %cst_9 : f32 to vector<24x1xf32>
    %40 = arith.mulf %38, %39 : vector<24x1xf32>
    %cst_10 = arith.constant 1.000000e+00 : f32
    %41 = vector.broadcast %cst_10 : f32 to vector<24x1xf32>
    %42 = arith.addf %40, %41 : vector<24x1xf32>
    %43 = vector.broadcast %3 : vector<1x16xf32> to vector<24x16xf32>
    %44 = vector.broadcast %42 : vector<24x1xf32> to vector<24x16xf32>
    %45 = arith.minimumf %43, %44 : vector<24x16xf32>
    %46 = vector.broadcast %4 : vector<1x16xf32> to vector<24x16xf32>
    %47 = vector.broadcast %40 : vector<24x1xf32> to vector<24x16xf32>
    %48 = arith.maximumf %46, %47 : vector<24x16xf32>
    %49 = arith.subf %45, %48 : vector<24x16xf32>
    %cst_11 = arith.constant 0.000000e+00 : f32
    %50 = vector.broadcast %cst_11 : f32 to vector<24x16xf32>
    %51 = arith.maximumf %49, %50 : vector<24x16xf32>
    %52 = arith.truncf %51 : vector<24x16xf32> to vector<24x16xbf16>
    %c0_12 = arith.constant 0 : index
    %c0_13 = arith.constant 0 : index
    %c0_14 = arith.constant 0 : index
    %53 = vector.load %arg2[%c0_12, %c0_13, %c0_14] : memref<1x16x128xbf16, #tpu.memory_space<vmem>>, vector<1x16x128xbf16>
    %54 = vector.shape_cast %53 : vector<1x16x128xbf16> to vector<16x128xbf16>
    %cst_15 = arith.constant dense<0.000000e+00> : vector<24x128xf32>
    %55 = tpu.matmul %52, %54, %cst_15 {dimension_numbers = #tpu.dot_dimension_numbers<[1], [0], [0], [1], [0, 0, 1, 1], [], []>} : vector<24x16xbf16>, vector<16x128xbf16>, vector<24x128xf32> -> vector<24x128xf32>
    %56 = tpu.iota {dimensions = array<i32: 1>} : vector<1x128xi32>
    %c32_i32 = arith.constant 32 : i32
    %57 = vector.broadcast %c32_i32 : i32 to vector<1x128xi32>
    %58 = arith.cmpi eq, %56, %57 : vector<1x128xi32>
    %cst_16 = arith.constant 1.000000e+00 : f32
    %59 = vector.shape_cast %58 : vector<1x128xi1> to vector<1x128xi1>
    %60 = vector.broadcast %59 : vector<1x128xi1> to vector<24x128xi1>
    %61 = vector.broadcast %cst_16 : f32 to vector<24x128xf32>
    %62 = vector.shape_cast %37 : vector<24x1xf32> to vector<24x1xf32>
    %63 = vector.broadcast %62 : vector<24x1xf32> to vector<24x128xf32>
    %64 = arith.select %60, %61, %63 : vector<24x128xi1>, vector<24x128xf32>
    %65 = arith.mulf %55, %64 : vector<24x128xf32>
    %c0_17 = arith.constant 0 : index
    %c0_18 = arith.constant 0 : index
    %c0_19 = arith.constant 0 : index
    %66 = vector.load %arg6[%c0_17, %c0_18, %c0_19] : memref<1x24x128xf32, #tpu.memory_space<vmem>>, vector<1x24x128xf32>
    %67 = vector.shape_cast %66 : vector<1x24x128xf32> to vector<24x128xf32>
    %68 = vector.shape_cast %65 : vector<24x128xf32> to vector<1x24x128xf32>
    tpu.vector_store %arg6[%c0_17, %c0_18, %c0_19], %68 {strides = array<i32>} : memref<1x24x128xf32, #tpu.memory_space<vmem>>, vector<1x24x128xf32>,
    return
  }
  func.func @transform_0(%arg0: i32, %arg1: i32) -> (i32, i32, i32) {
    %c0_i32 = arith.constant 0 : i32
    %c0_i32_0 = arith.constant 0 : i32
    %c0_i32_1 = arith.constant 0 : i32
    return %arg0, %c0_i32, %c0_i32_0 : i32, i32, i32
  }
  func.func @transform_1(%arg0: i32, %arg1: i32) -> (i32, i32, i32) {
    %c0_i32 = arith.constant 0 : i32
    %c0_i32_0 = arith.constant 0 : i32
    %c0_i32_1 = arith.constant 0 : i32
    return %arg0, %c0_i32, %c0_i32_0 : i32, i32, i32
  }
  func.func @transform_2(%arg0: i32, %arg1: i32) -> (i32, i32) {
    %c0_i32 = arith.constant 0 : i32
    %c0_i32_0 = arith.constant 0 : i32
    %c0_i32_1 = arith.constant 0 : i32
    return %c0_i32, %c0_i32_0 : i32, i32
  }
  func.func @transform_3(%arg0: i32, %arg1: i32) -> (i32, i32) {
    %c0_i32 = arith.constant 0 : i32
    %c0_i32_0 = arith.constant 0 : i32
    %c0_i32_1 = arith.constant 0 : i32
    return %c0_i32, %c0_i32_0 : i32, i32
  }
  func.func @transform_4(%arg0: i32, %arg1: i32) -> (i32, i32, i32) {
    %c0_i32 = arith.constant 0 : i32
    %c0_i32_0 = arith.constant 0 : i32
    return %arg0, %arg1, %c0_i32 : i32, i32, i32
  }
  func.func @transform_5(%arg0: i32, %arg1: i32) -> (i32, i32, i32) {
    %c0_i32 = arith.constant 0 : i32
    %c0_i32_0 = arith.constant 0 : i32
    %c0_i32_1 = arith.constant 0 : i32
    return %arg0, %c0_i32, %c0_i32_0 : i32, i32, i32
  }
  func.func @transform_6(%arg0: i32, %arg1: i32) -> (i32, i32, i32) {
    %c0_i32 = arith.constant 0 : i32
    %c0_i32_0 = arith.constant 0 : i32
    %c0_i32_1 = arith.constant 0 : i32
    return %arg0, %c0_i32, %c0_i32_0 : i32, i32, i32
  }
}

</mosaic_0001>

<bundles_post_ra>
// kernel: tpu_custom_call.1
= control target key start
LH: loop header
LB: loop body
LE: loop exit
PB: predicated region body
PF: predicated region fallthrough
CT: control target
= control target key end

     0   :  { %12 = vsyncpa [#allocation5], 0  ;;  %s1817_s0 = inlined_call_operand.vmem [shape: bf16[2,16,128], index: 0, kind: input, shape index: {}]   ;;  %s1818_s1 = inlined_call_operand.vmem [shape: f32[2,1,16], index: 1, kind: input, shape index: {}]   ;;  %s1819_s2 = inlined_call_operand.vmem [shape: bf16[384,32], index: 2, kind: input, shape index: {}]   ;;  %s1820_s3 = inlined_call_operand.vmem [shape: f32[8,32], index: 3, kind: input, shape index: {}]   ;;  %s1821_s4 = inlined_call_operand.hbm [shape: f32[2,24,128], index: 4, kind: output, shape index: {0}]   ;;  %s1822_s5 = inlined_call_operand.hbm [shape: f32[2,1,16], index: 5, kind: output, shape index: {1}]   ;;  %s1823_s6 = inlined_call_operand.vmem [shape: f32[2,1,1], index: 6, kind: output, shape index: {2}]  }
   0x1   :  { %14 = vsyncpa [#allocation5 + $0x1], 0 }
   0x2   :  { %15 = vsyncpa [#allocation7], 0 }
   0x3   :  { %17 = vsyncpa [#allocation7 + $0x1], 0  ;;  %s1506_s21 = smov 0   ;;  %s1508_s22 = smov 0  }
   0x4   :  { %s1510_s23 = smov 0   ;;  %s1512_s24 = smov 0  }
   0x5   :  { %s1514_s25 = smov 0   ;;  %s1516_s26 = smov 0  }
   0x6 LB: > { %s1121_s27 = sadd.s32 4294967295, %s1457_s26   ;;  %s1122_s28 = sadd.s32 4294967294, %s1457_s26   ;;  %s1457_s26 = sphi %s1516_s26, %s23_s26   ;;  %s1453_s25 = sphi %s1514_s25, %s1834_s25   ;;  %s1449_s24 = sphi %s1512_s24, %s1833_s24   ;;  %s1445_s23 = sphi %s1510_s23, %s1832_s23   ;;  %s1441_s22 = sphi %s1508_s22, %s1831_s22   ;;  %s1437_s21 = sphi %s1506_s21, %s1830_s21  }
   0x7   : > { %s35_s29 = sadd.s32 1, %s1453_s25  ;;  %s138_s30 = sadd.s32 1, %s1445_s23 }
   0x8   : > { %p37_p0 = scmp.ge.s32.totalorder %s35_s29, 2  ;;  %p148_p1 = scmp.ne.s32.totalorder %s1445_s23, %s1441_s22 }
   0x9   : > { %p149_p2 = scmp.eq.s32.totalorder %s1121_s27, 1  ;;  %p154_p3 = scmp.ne.s32.totalorder %s1441_s22, %s1437_s21 }
   0xa   : > { %s1836_s29 = smov (%p37_p0, %s35_s29), 0  ;;  %p155_p5 = scmp.eq.s32.totalorder %s1122_s28, 1 }
   0xb   : > { %p1546_p4 = por %p149_p2, %p148_p1  ;;  %s133_s8 = ssub.s32 %s1453_s25, %s1836_s29 }
   0xc   : > { %p1125_p6 = scmp.ge.s32.totalorder %s1457_s26, 1  ;;  %p136_p7 = scmp.eq.s32.totalorder %s133_s8, 0 }
   0xd   : > { %p1553_p8 = por %p155_p5, %p154_p3  ;;  %p245_p9 = scmp.lt.s32.totalorder %s1457_s26, 3 }
   0xe   : > { %s1559_s10 = scalar_select %p136_p7, %s1445_s23, %s138_s30  }
   0xf   : > { %p246_p10 = pnand %p1125_p6, %p245_p9 }
  0x10   : > { %v1303_v0 = vld [vmem:[%s1819_s2 + $0x40] sm:$0xff] (!%p246_p10)   ;;  %v1459_v2 = vmov (!%p246_p10), 0.0   ;;  %v1306_v4 = vld [vmem:[%s1819_s2 + $0x48] sm:$0xff] (!%p246_p10)   ;;  %v1309_v7 = vld [vmem:[%s1819_s2 + $0x50] sm:$0xff] (!%p246_p10)   ;;  %vm1460_vm0 = vmmov (!%p246_p10), 0   ;;  %p285_p11 = scmp.lt.s32.totalorder (!%p246_p10), %s1449_s24, 1  ;;  %v379_v32 = vlaneseq (!%p246_p10) }
  0x11   : > { %249 = sbr.rel (%p246_p10) target bundleno = 1635 (0x663), region = 36  ;;  %v1304_v1 = vld [vmem:[%s1819_s2] sm:$0xff] (!%p246_p10)   ;;  %1201 = vmatprep.subr.bf16.mxu1 (!%p246_p10), %v1459_v2  ;;  %1167 = vmatprep.subr.bf16.mxu0 (!%p246_p10), %v1303_v0  ;;  %v1307_v5 = vld [vmem:[%s1819_s2 + $0x8] sm:$0xff] (!%p246_p10)   ;;  %v1310_v8 = vld [vmem:[%s1819_s2 + $0x10] sm:$0xff] (!%p246_p10)   ;;  %vm313_vm1 = vcmask (!%p246_p10), 1040384   ;;  %vm609_vm5 = vcmask (!%p246_p10), 261120  }
  0x12   : > { %v1305_v3 = vld [vmem:[%s1819_s2 + $0x80] sm:$0xff] (!%p246_p10)   ;;  %1168 = vmatpush3.bf16.msra.mxu0 (!%p246_p10), %v1304_v1  ;;  %v1308_v6 = vld [vmem:[%s1819_s2 + $0x88] sm:$0xff] (!%p246_p10)   ;;  %1217 = vmatprep.mubr.msk.bf16.mxu1 (!%p246_p10), %vm1460_vm0, %v1459_v2  ;;  %v1311_v9 = vld [vmem:[%s1819_s2 + $0x90] sm:$0xff] (!%p246_p10)   ;;  %vm327_vm2 = vsmask.f32 (!%p246_p10), 256  ;;  %v1656_v33 = vshrl.u32 (!%p246_p10), %v379_v32, 7 }
  0x13   : > { %1202 = vmatpush3.bf16.msra.mxu1 (!%p246_p10), %v1305_v3  ;;  %1169 = vmatprep.subr.bf16.mxu0 (!%p246_p10), %v1306_v4  ;;  %v1312_v10 = vld [vmem:[%s1819_s2 + $0x58] sm:$0xff] (!%p246_p10)   ;;  %v1315_v13 = vld [vmem:[%s1819_s2 + $0x60] sm:$0xff] (!%p246_p10)   ;;  %v1318_v16 = vld [vmem:[%s1819_s2 + $0x68] sm:$0xff] (!%p246_p10)   ;;  %s1687_s17 = sand.u32 (!%p246_p10), 1, %s1441_s22   ;;  %vm730_vm6 = vcmask (!%p246_p10), 122880   ;;  %s1461_s18 = smov (!%p246_p10), 1  }
  0x14   : > { %1203 = vmatprep.subr.bf16.mxu1 (!%p246_p10), %v1459_v2  ;;  %v1313_v11 = vld [vmem:[%s1819_s2 + $0x18] sm:$0xff] (!%p246_p10)   ;;  %v1316_v14 = vld [vmem:[%s1819_s2 + $0x20] sm:$0xff] (!%p246_p10)   ;;  %v1319_v17 = vld [vmem:[%s1819_s2 + $0x28] sm:$0xff] (!%p246_p10)   ;;  %v1659_v34 = vsub.s32 (!%p246_p10), 0, %v1656_v33  ;;  %s279_s19 = scalar_lea.vmem (!%p246_p10), [#allocation6], %s1687_s17  ;;  %vm736_vm7 = vcmask (!%p246_p10), 7168  }
  0x15   : > { %v1314_v12 = vld [vmem:[%s1819_s2 + $0x98] sm:$0xff] (!%p246_p10)   ;;  %v1317_v15 = vld [vmem:[%s1819_s2 + $0xa0] sm:$0xff] (!%p246_p10)   ;;  %v1320_v18 = vld [vmem:[%s1819_s2 + $0xa8] sm:$0xff] (!%p246_p10)   ;;  %vm743_vm8 = vcmask (!%p246_p10), 15360   ;;  %s1463_s20 = smov (!%p246_p10), 4   ;;  %vm750_vm9 = vcmask (!%p246_p10), 31744  }
  0x16   : > { %1170 = vmatpush3.bf16.msra.mxu0 (!%p246_p10), %v1307_v5  ;;  %v1321_v19 = vld [vmem:[%s1819_s2 + $0x70] sm:$0xff] (!%p246_p10)   ;;  %v1324_v23 = vld [vmem:[%s1819_s2 + $0x78] sm:$0xff] (!%p246_p10)   ;;  %vm328_vm3 = vmand (!%p246_p10), %vm313_vm1, %vm327_vm2  ;;  %s1824_s27 = smov (!%p246_p10), 8   ;;  %vm757_vm10 = vcmask (!%p246_p10), 64512   ;;  %vm869_vm12 = vcmask (!%p246_p10), 130048   ;;  %s1163_s28 = sshll.u32 (!%p246_p10), %s1449_s24, 4 }
  0x17   : > { %1204 = vmatpush3.bf16.msra.mxu1 (!%p246_p10), %v1308_v6  ;;  %1171 = vmatprep.subr.bf16.mxu0 (!%p246_p10), %v1309_v7  ;;  %v1322_v20 = vld [vmem:[%s1819_s2 + $0x30] sm:$0xff] (!%p246_p10)   ;;  %v1325_v26 = vld [vmem:[%s1819_s2 + $0x38] sm:$0xff] (!%p246_p10)   ;;  %vm1153_vm4 = vmneg (!%p246_p10), %vm313_vm1  ;;  %v639_v6 = vsub.s32 (!%p246_p10), 1, %v1656_v33  ;;  %v645_v7 = vsub.s32 (!%p246_p10), 2, %v1656_v33  ;;  %s1734_s13 = scalar_lea.hbm (!%p246_p10), %s1822_s5, %s1163_s28  ;;  %s992_s14 = sshll.u32 (!%p246_p10), %s279_s19, 4  ;;  %s993_s14 = int_to_ptr.vmem [resolvable:$true] %s992_s14 }
  0x18   : > { %1205 = vmatprep.subr.bf16.mxu1 %v1459_v2  ;;  %s1607_s30 = scalar_select %p285_p11, %s1449_s24, 1  ;;  %v1323_v21 = vld [vmem:[%s1819_s2 + $0xb0] sm:$0xff]   ;;  %v1327_v28 = vld [vmem:[%s1819_s2 + $0xb8] sm:$0xff]   ;;  %v1664_v35 = vld [vmem:[%s1820_s3] sm:$0xff] }
  0x19   : > { %v382_v37 = vrot.slane %v1664_v35, %v1659_v34 }
  0x1a   : > { %1172 = vmatpush3.bf16.msra.mxu0 %v1310_v8  ;;  %s1166_s16 = sshll.u32 %s1607_s30, 3  ;;  %v640_v8 = vrot.slane %v1664_v35, %v639_v6  ;;  %s292_s15 = scalar_lea.vmem %s1818_s1, %s1607_s30 }
  0x1b   : > { %1206 = vmatpush3.bf16.msra.mxu1 %v1311_v9  ;;  %1173 = vmatprep.subr.bf16.mxu0 %v1312_v10  ;;  %s1632_s12 = scalar_lea.vmem %s1817_s0, %s1166_s16  ;;  %v646_v10 = vrot.slane %v1664_v35, %v645_v7  ;;  %s1462_s16 = smov 2  }
  0x1c   : > { %1207 = vmatprep.subr.bf16.mxu1 %v1459_v2  ;;  %v1326_v22 = vld [vmem:[%s1632_s12] sm:$0xff]  }
  0x1d   : > { %v319_v24 = vshrl.u32 %v1326_v22, 16  ;;  %v322_v25 = vshll.u32 %v1326_v22, 16  ;;  %v312_v30 = vrot.slane %v1326_v22, 7 }
  0x1e   : > { %1174 = vmatpush3.bf16.msra.mxu0 %v1313_v11 }
  0x1f   : > { %1208 = vmatpush3.bf16.msra.mxu1 %v1314_v12  ;;  %1175 = vmatprep.subr.bf16.mxu0 %v1315_v13  ;;  %v321_v27 = vrot.slane %v319_v24, 7 }
  0x20   : > { %1209 = vmatprep.subr.bf16.mxu1 %v1459_v2 }
  0x21   : > { %v324_v29 = vor.u32 %v322_v25, %v321_v27 }
  0x22   : > { %1176 = vmatpush3.bf16.msra.mxu0 %v1316_v14 }
  0x23   : > { %1210 = vmatpush3.bf16.msra.mxu1 %v1317_v15  ;;  %1177 = vmatprep.subr.bf16.mxu0 %v1318_v16  ;;  %v329_v31 = vsel %vm328_vm3, 0, %v324_v29 }
  0x24   : > { %1211 = vmatprep.subr.bf16.mxu1 %v1459_v2  ;;  %559 = vmatprep.mubr.bf16.mxu0 %v329_v31 }
  0x26   : > { %1178 = vmatpush3.bf16.msra.mxu0 %v1319_v17 }
  0x27   : > { %1212 = vmatpush3.bf16.msra.mxu1 %v1320_v18  ;;  %1179 = vmatprep.subr.bf16.mxu0 %v1321_v19 }
  0x28   : > { %1213 = vmatprep.subr.bf16.mxu1 %v1459_v2 }
  0x2a   : > { %1180 = vmatpush3.bf16.msra.mxu0 %v1322_v20 }
  0x2b   : > { %1214 = vmatpush3.bf16.msra.mxu1 %v1323_v21  ;;  %1181 = vmatprep.subr.bf16.mxu0 %v1324_v23 }
  0x2c   : > { %1215 = vmatprep.subr.bf16.mxu1 %v1459_v2 }
  0x2e   : > { %1182 = vmatpush3.bf16.msra.mxu0 %v1325_v26 }
  0x2f   : > { %1216 = vmatpush3.bf16.msra.mxu1 %v1327_v28  ;;  %v669_v28 = vsub.s32 3, %v1656_v33 }
  0x31   : > { %1154 = vmatmul.mubr.msk.bf16.vlgmr.msra.gmra.mrb[0].mxu0 %vm1153_vm4, %v312_v30 }
  0x32   : > { %1218 = vmatmul.mubr.bf16.vlgmr.msra.gmra.mrb[0].mxu1 %v1326_v22 }
 0x104   : > { %v1183_v36 = vpop.f32.mrb[0].mxu0 }
 0x105   : > { %v1184_v38 = vpop.f32.mrb[1].mxu0  ;;  %v602_v39 = vpop.f32.mrb[0].mxu1 }
 0x106   : > { %v1185_v40 = vadd.f32 %v1184_v38, %v1183_v36  ;;  %v1186_v41 = vpop.f32.mrb[2].mxu0  ;;  %v1219_v42 = vpop.f32.mrb[1].mxu1  ;;  %v670_v36 = vrot.slane %v1664_v35, %v669_v28 }
 0x107   : > { %v1187_v43 = vpop.f32.mrb[3].mxu0  ;;  %v605_v44 = vpop.f32.mrb[2].mxu1 }
 0x108   : > { %v562_v45 = vadd.f32 %v1185_v40, %v382_v37  ;;  %v1188_v46 = vadd.f32 %v1187_v43, %v1186_v41  ;;  %v1220_v47 = vpop.f32.mrb[3].mxu1 }
 0x10a   : > { %v603_v48 = vadd.f32 %v602_v39, %v562_v45  ;;  %v565_v49 = vadd.f32 %v1188_v46, %v382_v37  ;;  %v681_v46 = vsub.s32 4, %v1656_v33 }
 0x10c   : > { %v606_v50 = vadd.f32 %v605_v44, %v565_v49  ;;  %v610_v51 = vsel %vm609_vm5, %v603_v48, 0.0  ;;  %v682_v47 = vrot.slane %v1664_v35, %v681_v46 }
 0x10d   : > { %611 = vadd.xlane.f32.xlu0 %v610_v51 }
 0x10e   : > { %v613_v52 = vsel %vm609_vm5, %v606_v50, 0.0 }
 0x111   : > { %614 = vadd.xlane.f32.xlu0 %v613_v52 }
 0x19a   : > { %v612_v53 = vpop.xlane.xlu0 %611 }
 0x19b   : > { %v617_v54 = vmul.f32 0.03125, %v612_v53 }
 0x19d   : > { %v619_v55 = vsub.f32 %v603_v48, %v617_v54 }
 0x19e   : > { %v615_v56 = vpop.xlane.xlu0 %614 }
 0x19f   : > { %v618_v57 = vmul.f32 0.03125, %v615_v56  ;;  %v621_v58 = vmul.f32 %v619_v55, %v619_v55 }
 0x1a1   : > { %v620_v59 = vsub.f32 %v606_v50, %v618_v57  ;;  %v623_v60 = vsel %vm609_vm5, %v621_v58, 0.0 }
 0x1a2   : > { %624 = vadd.xlane.f32.xlu1 %v623_v60 }
 0x1a3   : > { %v622_v61 = vmul.f32 %v620_v59, %v620_v59 }
 0x1a5   : > { %v626_v62 = vsel %vm609_vm5, %v622_v61, 0.0  ;;  %v304_v61 = vld [vmem:[%s292_s15] sm:$0x1]  ;;  %s959_s15 = scalar_lea.sflag [#allocation7], %s1687_s17 }
 0x1a6   : > { %627 = vadd.xlane.f32.xlu1 %v626_v62  ;;  %v305_v62 = vsub.f32 1.0, %v304_v61 }
 0x22f   : > { %v625_v63 = vpop.xlane.xlu1 %624 }
 0x230   : > { %v629_v0 = vmul.f32 0.03125, %v625_v63 }
 0x232   : > { %v631_v1 = vadd.f32 1e-05, %v629_v0 }
 0x233   : > { %v628_v3 = vpop.xlane.xlu1 %627 }
 0x234   : > { %1329 = vrsqrt.f32 %v631_v1  ;;  %v630_v4 = vmul.f32 0.03125, %v628_v3 }
 0x236   : > { %v632_v5 = vadd.f32 1e-05, %v630_v4 }
 0x238   : > { %1331 = vrsqrt.f32 %v632_v5 }
 0x23e   : > { %v1330_v9 = vpop.eup %1329 }
 0x23f   : > { %v635_v11 = vmul.f32 %v1330_v9, %v619_v55 }
 0x241   : > { %v641_v12 = vmul.f32 %v640_v8, %v635_v11 }
 0x242   : > { %v1332_v13 = vpop.eup %1331 }
 0x243   : > { %v647_v14 = vadd.f32 %v646_v10, %v641_v12  ;;  %v636_v15 = vmul.f32 %v1332_v13, %v620_v59  ;;  %v1465_v12 = vmov 15  }
 0x244   : > { %1301 = vset.pattern.permute.xlu1 %v1465_v12 }
 0x245   : > { %v642_v16 = vmul.f32 %v640_v8, %v636_v15  ;;  %v651_v17 = vmul.f32 0.044715, %v647_v14  ;;  %v649_v30 = vmul.f32 0.5, %v647_v14  ;;  %v1328_v8 = vld [vmem:[%s1632_s12] sm:$0xff]   ;;  %s1467_s12 = smov 113  }
 0x246   : > { %1221 = vmatprep.subr.bf16.mxu0 %v1328_v8 }
 0x247   : > { %v648_v18 = vadd.f32 %v646_v10, %v642_v16  ;;  %v653_v19 = vmul.f32 %v651_v17, %v647_v14  ;;  %1222 = vmatpush3.bf16.msra.mxu0 %v1328_v8  ;;  %v778_v16 = vadd.s32 8, %v1656_v33  ;;  %v1699_v17 = vadd.s32 16, %v1656_v33 }
 0x249   : > { %v655_v20 = vmul.f32 %v653_v19, %v647_v14  ;;  %v652_v21 = vmul.f32 0.044715, %v648_v18  ;;  %v650_v40 = vmul.f32 0.5, %v648_v18  ;;  %v829_v19 = vcvt.s32.f32 %v1656_v33 }
 0x24b   : > { %v657_v22 = vadd.f32 %v655_v20, %v647_v14  ;;  %v654_v23 = vmul.f32 %v652_v21, %v648_v18  ;;  %v830_v20 = vcvt.s32.f32 %v778_v16  ;;  %v831_v21 = vcvt.s32.f32 %v1699_v17 }
 0x24d   : > { %v659_v24 = vmul.f32 0.7978846, %v657_v22  ;;  %v656_v25 = vmul.f32 %v654_v23, %v648_v18  ;;  %v832_v22 = vadd.f32 1.0, %v829_v19  ;;  %v833_v23 = vadd.f32 1.0, %v830_v20 }
 0x24f   : > { %1333 = vtanh.f32 %v659_v24  ;;  %v658_v26 = vadd.f32 %v656_v25, %v648_v18  ;;  %v834_v25 = vadd.f32 1.0, %v831_v21 }
 0x251   : > { %v660_v27 = vmul.f32 0.7978846, %v658_v26 }
 0x253   : > { %1335 = vtanh.f32 %v660_v27 }
 0x259   : > { %v1334_v29 = vpop.eup %1333 }
 0x25a   : > { %v663_v31 = vadd.f32 1.0, %v1334_v29 }
 0x25c   : > { %v665_v37 = vmul.f32 %v663_v31, %v649_v30 }
 0x25d   : > { %v1336_v38 = vpop.eup %1335 }
 0x25e   : > { %v671_v39 = vmul.f32 %v670_v36, %v665_v37  ;;  %v664_v41 = vadd.f32 1.0, %v1336_v38 }
 0x260   : > { %v673_v42 = vsel %vm609_vm5, %v671_v39, 0.0  ;;  %v666_v43 = vmul.f32 %v664_v41, %v650_v40 }
 0x261   : > { %674 = vadd.xlane.f32.xlu0 %v673_v42 }
 0x262   : > { %v672_v44 = vmul.f32 %v670_v36, %v666_v43 }
 0x264   : > { %v676_v45 = vsel %vm609_vm5, %v672_v44, 0.0 }
 0x265   : > { %677 = vadd.xlane.f32.xlu1 %v676_v45 }
 0x2ee   : > { %v675_v48 = vpop.xlane.xlu0 %674 }
 0x2ef   : > { %v683_v49 = vadd.f32 %v682_v47, %v675_v48  ;;  %v1466_v48 = vmov 0  }
 0x2f1   : > { %v685_v50 = vsub.f32 0.0, %v683_v49 }
 0x2f2   : > { %v678_v51 = vpop.xlane.xlu1 %677 }
 0x2f3   : > { %v687_v52 = vmul.f32 1.442695, %v685_v50  ;;  %v684_v53 = vadd.f32 %v682_v47, %v678_v51 }
 0x2f5   : > { %1337 = vpow2.f32 %v687_v52  ;;  %v686_v54 = vsub.f32 0.0, %v684_v53 }
 0x2f7   : > { %v689_v55 = vmul.f32 1.442695, %v686_v54 }
 0x2f9   : > { %1339 = vpow2.f32 %v689_v55 }
 0x2ff   : > { %v1338_v56 = vpop.eup %1337 }
 0x300   : > { %v691_v57 = vadd.f32 1.0, %v1338_v56 }
 0x302   : > { %1341 = vrcp.f32 %v691_v57 }
 0x303   : > { %v1340_v58 = vpop.eup %1339 }
 0x304   : > { %v692_v59 = vadd.f32 1.0, %v1340_v58 }
 0x306   : > { %1343 = vrcp.f32 %v692_v59 }
 0x30c   : > { %v1342_v60 = vpop.eup %1341 }
 0x30d   : > { %697 = vxpose.xlu0.b32.start [1/2] (short) (narrow) %v1342_v60, 8 }
 0x310   : > { %v1344_v35 = vpop.eup %1343 }
 0x311   : > { %698 = vxpose.xlu0.b32.end [2/2] (short) (narrow) %v1344_v35, 8 }
 0x33a   : > { %1302 = vset.pattern.permute.xlu0 %v1465_v12 }
 0x38d   : > { %v713_v63 = vpop.trf.xlu0 }
 0x38e   : > { %v729_v0 = vmul.f32 %v713_v63, %v305_v62 }
 0x390   : > { %733 = vrot.lane.b32.xlu1 %v729_v0, %s1461_s18  ;;  %731 = vst.msk [vmem:[%s279_s19] sm:$0x1] %vm730_vm6, %v729_v0  ;;  %s1347_s18 = scalar_lea.vmem %s993_s14, 16 }
 0x391   : > { %p1348_p12 = scmp.ne.s32.totalorder %s993_s14, %s1347_s18 }
 0x393   : > { %p1349_p13 = pnand %p1348_p12, %p1546_p4 }
 0x395   : > { %p1350_p0 = pneg %p1349_p13 }
 0x402   : > { %v734_v1 = vpop.permute.xlu1 %733 }
 0x403   : > { %v737_v3 = vsel %vm736_vm7, 0.0, %v734_v1 }
 0x404   : > { %v738_v4 = vadd.f32 %v737_v3, %v729_v0 }
 0x406   : > { %740 = vrot.lane.b32.xlu1 %v738_v4, %s1462_s16  ;;  %s1468_s16 = smov [#allocation6]  }
 0x478   : > { %v741_v5 = vpop.permute.xlu1 %740 }
 0x479   : > { %v744_v6 = vsel %vm743_vm8, 0.0, %v741_v5 }
 0x47a   : > { %v745_v7 = vadd.f32 %v744_v6, %v738_v4 }
 0x47c   : > { %747 = vrot.lane.b32.xlu1 %v745_v7, %s1463_s20  ;;  %s1351_s20 = sshll.u32 %s1468_s16, 4  ;;  %s1352_s20 = int_to_ptr.vmem [resolvable:$false] %s1351_s20 }
 0x47d   : > { %p1354_p1 = scmp.lt.s32.totalorder %s993_s14, %s1352_s20 }
 0x4ee   : > { %v748_v9 = vpop.permute.xlu1 %747 }
 0x4ef   : > { %v751_v10 = vsel %vm750_vm9, 0.0, %v748_v9 }
 0x4f0   : > { %v752_v11 = vadd.f32 %v751_v10, %v745_v7 }
 0x4f2   : > { %754 = vrot.lane.b32.xlu1 %v752_v11, %s1824_s27  ;;  %s1353_s27 = scalar_lea.vmem %s1352_s20, 32 }
 0x4f3   : > { %p1355_p2 = scmp.lt.s32.totalorder %s1353_s27, %s1347_s18 }
 0x4f5   : > { %p1356_p3 = por %p1355_p2, %p1354_p1 }
 0x4f7   : > { %p1357_p5 = pnand %p1356_p3, %p1350_p0 }
 0x564   : > { %v755_v13 = vpop.permute.xlu1 %754 }
 0x565   : > { %v758_v14 = vsel %vm757_vm10, 0.0, %v755_v13 }
 0x566   : > { %v1695_v15 = vadd.f32 %v758_v14, %v752_v11 }
 0x568   : > { %760 = vst.msk [vmem:[#allocation2] sm:$0x1] %vm730_vm6, %v1695_v15  ;;  %v761_v18 = vsub.f32 %v1695_v15, %v729_v0 }
 0x56a   : > { %762 = vst.msk [vmem:[#allocation3] sm:$0x1] %vm730_vm6, %v761_v18 }
 0x56f   : > { %v769_v24 = vld [vmem:[#allocation2] sm:$0x1] }
 0x570   : > { %v839_v26 = vrot.slane %v769_v24, %v1659_v34  ;;  %v771_v27 = vfloor.f32 %v769_v24 }
 0x571   : > { %v1158_v28 = vld [vmem:[#allocation3] ss:$0 sm:$0xff] }
 0x572   : > { %v841_v29 = vmin.f32 %v839_v26, %v832_v22  ;;  %v842_v30 = vmin.f32 %v839_v26, %v833_v23  ;;  %v850_v31 = vmax.f32 %v1158_v28, %v829_v19  ;;  %v851_v36 = vmax.f32 %v1158_v28, %v830_v20 }
 0x573   : > { %v843_v37 = vmin.f32 %v839_v26, %v834_v25  ;;  %v852_v38 = vmax.f32 %v1158_v28, %v831_v21  ;;  %v1228_v39 = vtrunc.f32 %v771_v27  ;;  %v773_v40 = vsub.f32 %v769_v24, %v771_v27 }
 0x574   : > { %v853_v41 = vsub.f32 %v841_v29, %v850_v31  ;;  %v854_v42 = vsub.f32 %v842_v30, %v851_v36 }
 0x575   : > { %v855_v43 = vsub.f32 %v843_v37, %v852_v38  ;;  %v1229_v44 = vcvt.f32.s32 %v1228_v39  ;;  %vm774_vm11 = vcmp.ge.f32.partialorder %v773_v40, 0.5  ;;  %v800_v45 = vmax.f32 %v773_v40, 1e-08 }
 0x576   : > { %v856_v46 = vmax.f32 %v853_v41, 0.0  ;;  %v857_v47 = vmax.f32 %v854_v42, 0.0  ;;  %v791_v49 = vsel %vm774_vm11, 1, %v1466_v48 }
 0x577   : > { %v858_v50 = vmax.f32 %v855_v43, 0.0  ;;  %1345 = vrcp.f32 %v800_v45  ;;  %v812_v53 = vadd.s32 %v1229_v44, %v791_v49  ;;  %v787_v54 = vrot.slane %v1229_v44, %v1659_v34 }
 0x578   : > { %v859_v51 = vpack.c.bf16 %v857_v47, %v856_v46  ;;  %v795_v55 = vrot.slane %v791_v49, %v1659_v34 }
 0x579   : > { %v860_v52 = vpack.c.bf16 %v858_v50, %v858_v50  ;;  %v816_v56 = vrot.slane %v812_v53, %v1659_v34  ;;  %vm788_vm13 = vcmp.eq.s32.totalorder %v1656_v33, %v787_v54  ;;  %vm789_vm0 = vcmp.eq.s32.totalorder %v778_v16, %v787_v54 }
 0x57a   : > { %1223 = vmatprep.mubr.msk.bf16.mxu0 %vm869_vm12, %v859_v51  ;;  %vm1712_vm14 = vcmp.eq.s32.totalorder %v795_v55, 1  ;;  %vm790_vm4 = vcmp.eq.s32.totalorder %v1699_v17, %v787_v54 }
 0x57b   : > { %1224 = vmatmul.mubr.msk.bf16.vlgmr.msra.gmra.mrb[4].mxu0 %vm869_vm12, %v860_v52  ;;  %vm817_vm15 = vcmp.lt.s32.totalorder %v1656_v33, %v816_v56  ;;  %vm797_vm1 = vmand %vm788_vm13, %vm1712_vm14  ;;  %vm818_vm3 = vcmp.lt.s32.totalorder %v778_v16, %v816_v56  ;;  %vm819_vm6 = vcmp.lt.s32.totalorder %v1699_v17, %v816_v56 }
 0x57c   : > { %v1155_v35 = vsel %vm817_vm15, 1.0, %v1459_v2  ;;  %vm798_vm2 = vmand %vm789_vm0, %vm1712_vm14  ;;  %v1156_v33 = vsel %vm818_vm3, 1.0, %v1459_v2  ;;  %v1157_v0 = vsel %vm819_vm6, 1.0, %v1459_v2 }
 0x57d   : > { %vm799_vm5 = vmand %vm790_vm4, %vm1712_vm14 }
 0x581   : > { %v1346_v58 = vpop.eup %1345 }
 0x582   : > { %v807_v59 = vrot.slane %v1346_v58, %v1659_v34 }
 0x584   : > { %v809_v60 = vsel %vm797_vm1, %v807_v59, 1.0  ;;  %v810_v62 = vsel %vm798_vm2, %v807_v59, 1.0  ;;  %v811_v63 = vsel %vm799_vm5, %v807_v59, 1.0 }
 0x585   : > { %v826_v61 = vmul.f32 %v1155_v35, %v809_v60  ;;  %v827_v34 = vmul.f32 %v1156_v33, %v810_v62  ;;  %v828_v1 = vmul.f32 %v1157_v0, %v811_v63 }
 0x587   : > { %931 = vperm.xlu1 %1301, %v826_v61  }
 0x58b   : > { %936 = vperm.xlu1 %1301, %v827_v34  }
 0x58f   : > { %941 = vperm.xlu1 %1301, %v828_v1  }
 0x593   : > { %764 = vrot.lane.b32.xlu1 %v1695_v15, %s1467_s12 }
 0x594   : > { %1360 = shalt.err (!%p1357_p5)
}
 0x595   : > { %s1361_s19 = scalar_lea.hbm %s1734_s13, 16  ;;  %s1365_s8 = scalar_lea.hbm %s1822_s5, 32 }
 0x596   : > { %p1362_p6 = scmp.ne.s32.totalorder %s1734_s13, %s1361_s19  ;;  %p1366_p10 = scmp.lt.u32.totalorder %s1734_s13, %s1822_s5 }
 0x597   : > { %p1367_p11 = scmp.lt.u32.totalorder %s1365_s8, %s1361_s19  ;;  %p1369_p13 = scmp.lt.u32.totalorder %s1361_s19, %s1734_s13 }
 0x598   : > { %p1363_p7 = pnand %p1362_p6, %p1546_p4 }
 0x599   : > { %p1368_p12 = por %p1367_p11, %p1366_p10 }
 0x59a   : > { %p1364_p9 = pneg %p1363_p7 }
 0x59b   : > { %p1370_p0 = por %p1369_p13, %p1368_p12 }
 0x59d   : > { %p1371_p1 = pnand %p1370_p0, %p1364_p9 }
 0x59f   : > { %1374 = shalt.err (!%p1371_p1)
}
 0x5a0   : > { %1232 = dma.vmem_to_hbm [thread:$0]  (%p1546_p4), %s993_s14, 16, %s1734_s13, %s959_s15   ;;  %vm767_vm7 = vcmask 0   ;;  %v925_v6 = vand.u32 127, %v379_v32 }
 0x5a1   : > { %s296_s20 = scalar_lea.vmem %s1823_s6, %s1607_s30  ;;  %s1227_s19 = smul.u32 24, %s1687_s17 }
 0x5a2   : > { %vm926_vm8 = vcmp.eq.s32.totalorder %v925_v6, 32  ;;  %s1230_s13 = smul.u32 384, %s1449_s24  ;;  %s954_s15 = scalar_lea.sflag [#allocation5], %s1687_s17 }
 0x5a3   : > { %s273_s12 = scalar_lea.vmem [#allocation4], %s1227_s19  ;;  %s1469_s11 = smov [#allocation4]  }
 0x5a4   : > { %s976_s28 = sshll.u32 %s273_s12, 4  ;;  %s1768_s24 = scalar_lea.hbm %s1821_s4, %s1230_s13  ;;  %s1763_s28 = int_to_ptr.vmem [resolvable:$true] %s976_s28 }
 0x5a5   : > { %s1375_s8 = scalar_lea.vmem %s1763_s28, 384  ;;  %s1379_s16 = sshll.u32 %s1469_s11, 4  ;;  %s1380_s16 = int_to_ptr.vmem [resolvable:$false] %s1379_s16 }
 0x5a6   : > { %p1376_p2 = scmp.ne.s32.totalorder %s1763_s28, %s1375_s8  ;;  %s1381_s27 = scalar_lea.vmem %s1380_s16, 768 }
 0x5a7   : > { %p1382_p6 = scmp.lt.s32.totalorder %s1763_s28, %s1380_s16  ;;  %p1383_p7 = scmp.lt.s32.totalorder %s1381_s27, %s1375_s8 }
 0x5a8   : > { %p1377_p3 = pnand %p1376_p2, %p1546_p4 }
 0x5a9   : > { %p1384_p9 = por %p1383_p7, %p1382_p6 }
 0x5aa   : > { %p1378_p5 = pneg %p1377_p3 }
 0x5ac   : > { %p1385_p10 = pnand %p1384_p9, %p1378_p5 }
 0x606   : > { %v932_v2 = vpop.permute.xlu1 %931 }
 0x607   : > { %v944_v9 = vsel %vm926_vm8, 1.0, %v932_v2 }
 0x60a   : > { %v937_v3 = vpop.permute.xlu1 %936 }
 0x60b   : > { %v945_v14 = vsel %vm926_vm8, 1.0, %v937_v3 }
 0x60e   : > { %v942_v4 = vpop.permute.xlu1 %941 }
 0x60f   : > { %v946_v7 = vsel %vm926_vm8, 1.0, %v942_v4 }
 0x612   : > { %v765_v5 = vpop.permute.xlu1 %764 }
 0x613   : > { %768 = vst.msk [vmem:[%s296_s20] sm:$0x1] %vm767_vm7, %v765_v5 }
 0x64e   : > { %v1225_v8 = vpop.f32.mrb[4].mxu0 }
 0x64f   : > { %v949_v10 = vmul.f32 %v1225_v8, %v946_v7  ;;  %v910_v11 = vpop.f32.mrb[5].mxu0 }
 0x650   : > { %v947_v12 = vmul.f32 %v944_v9, %v910_v11  ;;  %v1226_v13 = vpop.f32.mrb[6].mxu0 }
 0x651   : > { %952 = vst [vmem:[%s273_s12 + $0x10] sm:$0xff] %v949_v10  ;;  %v913_v32 = vpop.f32.mrb[7].mxu0 }
 0x652   : > { %950 = vst [vmem:[%s273_s12] sm:$0xff] %v947_v12  ;;  %v948_v15 = vmul.f32 %v945_v14, %v913_v32 }
 0x654   : > { %951 = vst [vmem:[%s273_s12 + $0x8] sm:$0xff] %v948_v15 }
 0x655   : > { %1388 = shalt.err (!%p1385_p10)
}
 0x656   : > { %s1389_s18 = scalar_lea.hbm %s1768_s24, 384  ;;  %s1393_s12 = scalar_lea.hbm %s1821_s4, 768 }
 0x657   : > { %p1390_p11 = scmp.ne.s32.totalorder %s1768_s24, %s1389_s18  ;;  %p1394_p0 = scmp.lt.u32.totalorder %s1768_s24, %s1821_s4 }
 0x658   : > { %p1395_p1 = scmp.lt.u32.totalorder %s1393_s12, %s1389_s18  ;;  %p1397_p3 = scmp.lt.u32.totalorder %s1389_s18, %s1768_s24 }
 0x659   : > { %p1391_p12 = pnand %p1390_p11, %p1546_p4 }
 0x65a   : > { %p1396_p2 = por %p1395_p1, %p1394_p0 }
 0x65b   : > { %p1392_p13 = pneg %p1391_p12 }
 0x65c   : > { %p1398_p5 = por %p1397_p3, %p1396_p2 }
 0x65e   : > { %p1399_p6 = pnand %p1398_p5, %p1392_p13 }
 0x660   : > { %1402 = shalt.err (!%p1399_p6)
}
 0x661   : > { %s1470_s14 = smov 128   ;;  %s1829_s8 = smov 8  }
 0x662   : > { %1231 = dma.vmem_to_hbm [thread:$0]  (%p1546_p4), %s1763_s28, 384, %s1768_s24, %s954_s15, %s1470_s14, %s1470_s14, %s1829_s8  }
 0x663 PF: > { %p1242_p7 = scmp.ge.s32.totalorder %s1457_s26, 2  ;;  %s1007_s11 = sand.u32 1, %s1437_s21  }
 0x664   : > { %s1008_s16 = scalar_lea.sflag [#allocation5], %s1007_s11 }
 0x665   : > { %p1236_p9 = pnand %p1242_p7, %p1553_p8 }
 0x667   : > { %1428 = dma.done.wait (!%p1236_p9), %s1008_s16, 384  }
 0x668   : > { %1430 = vsyncadd (!%p1236_p9), %s1008_s16, 4294966912  ;;  %s1017_s27 = scalar_lea.sflag [#allocation7], %s1007_s11 }
 0x669   : > { %1432 = dma.done.wait (!%p1236_p9), %s1017_s27, 16  }
 0x66a   : > { %1434 = vsyncadd (!%p1236_p9), %s1017_s27, 4294967280  ;;  %s23_s26 = sadd.s32 1, %s1457_s26   ;;  %s1830_s21 = smov %s1441_s22 }
 0x66b   : > { %p20_p10 = scmp.ge.s32.totalorder %s23_s26, 4   ;;  %s1831_s22 = smov %s1445_s23 }
 0x66c   : > { %s1832_s23 = smov %s1559_s10  ;;  %s1833_s24 = smov %s1453_s25 }
 0x66d   : > { %s1834_s25 = smov %s1836_s29  ;;  %22 = sbr.rel (!%p20_p10) target bundleno = 6 (0x6), region = 107 }
 0x674   :  { %1027 = vsyncpa [#allocation5], 1 }
 0x675   :  { %1029 = vsyncpa [#allocation5 + $0x1], 1 }
 0x676   :  { %1030 = vsyncpa [#allocation7], 1 }
 0x677   :  { %1032 = vsyncpa [#allocation7 + $0x1], 1 }

</bundles_post_ra>
